<compile_context>
chip_gen: v7x
topology: tpu7x:2x2x1
jax: 0.10.0
libtpu: 0.0.40
codegen_flags: <defaults>
</compile_context>

<pallas_src>
import jax
import jax.numpy as jnp
from jax.experimental import pallas as pl
from jax.experimental.pallas import tpu as pltpu


def _round_up(x: int, m: int) -> int:
    return ((x + m - 1) // m) * m


def _mlp_kernel(x_ref, w1_ref, w2_ref, w3_ref, b3_ref, out_ref):
    # Layer 1: Linear (no bias, bf16 inputs, f32 accumulation) + ReLU.
    h = jnp.dot(x_ref[...], w1_ref[...], preferred_element_type=jnp.float32)
    h = jnp.maximum(h, 0.0).astype(w2_ref.dtype)     # back to bf16 for next MXU pass
    # (Dropout -> identity at inference)
    # Layer 2: Linear (no bias) + ReLU.
    h = jnp.dot(h, w2_ref[...], preferred_element_type=jnp.float32)
    h = jnp.maximum(h, 0.0).astype(w3_ref.dtype)
    # (Dropout -> identity at inference)
    # Layer 3: Linear with bias -> logits (bias added in f32).
    logits = jnp.dot(h, w3_ref[...], preferred_element_type=jnp.float32)
    logits = logits + b3_ref[...]                    # b3 is (1, NC_pad), broadcasts over rows
    out_ref[...] = logits.astype(out_ref.dtype)


def linear_classifier_forward(x, w1, w2, w3, b3, *, tile_b: int = 256):
    """Forward pass.

    x : (B, C_in)           activations
    w1: (C_in, H)           layer-1 weight, pre-transposed for x @ W
    w2: (H, H)              layer-2 weight
    w3: (H, num_classes)    layer-3 weight
    b3: (1, num_classes)    layer-3 bias
    """
    B, C_in = x.shape
    H = w1.shape[1]
    NC = w3.shape[1]

    # --- lane padding to multiples of 128 (MXU / vreg width) -----------------
    C_pad = _round_up(C_in, 128)
    H_pad = _round_up(H, 128)
    NC_pad = _round_up(NC, 128)

    # --- batch tiling ---------------------------------------------------------
    # Large MXU-aligned tiles when the batch allows it; for tiny batches use a
    # single tile rounded to the sublane multiple (8).
    TILE_B = min(tile_b, _round_up(B, 8))
    B_pad = _round_up(B, TILE_B)
    grid = (B_pad // TILE_B,)

    compute_dtype = jnp.bfloat16

    # Zero-pad + cast. Zero padding is exact: padded K-columns/rows contribute
    # exact zeros to the f32 accumulators.
    xp = jnp.zeros((B_pad, C_pad), compute_dtype).at[:B, :C_in].set(
        x.astype(compute_dtype))
    w1p = jnp.zeros((C_pad, H_pad), compute_dtype).at[:C_in, :H].set(
        w1.astype(compute_dtype))
    w2p = jnp.zeros((H_pad, H_pad), compute_dtype).at[:H, :H].set(
        w2.astype(compute_dtype))
    w3p = jnp.zeros((H_pad, NC_pad), compute_dtype).at[:H, :NC].set(
        w3.astype(compute_dtype))
    b3p = jnp.zeros((1, NC_pad), jnp.float32).at[:, :NC].set(
        b3.astype(jnp.float32))

    out_padded = pl.pallas_call(
        _mlp_kernel,
        out_shape=jax.ShapeDtypeStruct((B_pad, NC_pad), x.dtype),
        grid_spec=pltpu.PrefetchScalarGridSpec(
            num_scalar_prefetch=0,
            grid=grid,
            in_specs=[
                # Activations stream over the batch grid.
                pl.BlockSpec((TILE_B, C_pad), lambda i: (i, 0)),
                # Weights / bias: one constant block, stays VMEM-resident.
                pl.BlockSpec((C_pad, H_pad), lambda i: (0, 0)),
                pl.BlockSpec((H_pad, H_pad), lambda i: (0, 0)),
                pl.BlockSpec((H_pad, NC_pad), lambda i: (0, 0)),
                pl.BlockSpec((1, NC_pad), lambda i: (0, 0)),
            ],
            out_specs=pl.BlockSpec((TILE_B, NC_pad), lambda i: (i, 0)),
        ),
        compiler_params=pltpu.CompilerParams(
            # Batch tiles are independent -> megacore sharding on v7x.
            dimension_semantics=("parallel",),
            # Conservative: fits v7x's 64 MiB physical VMEM with headroom,
            # well above what weights + double-buffered batch tiles need here.
            vmem_limit_bytes=48 * 1024 * 1024,
        ),
    )(xp, w1p, w2p, w3p, b3p)

    # Drop batch / class padding.
    return out_padded[:B, :NC]


def init_params(key, in_channels, hidden_size, num_classes, dtype=jnp.float32):
    """Deterministic (Kaiming-uniform-like) init matching nn.Linear shapes, pre-transposed."""
    k1, k2, k3, k4 = jax.random.split(key, 4)

    def lin_w(k, fan_in, fan_out):
        bound = 1.0 / jnp.sqrt(fan_in)
        # torch stores (out, in); we store transposed (in, out) for x @ W.
        return jax.random.uniform(k, (fan_in, fan_out), dtype, -bound, bound)

    w1 = lin_w(k1, in_channels, hidden_size)
    w2 = lin_w(k2, hidden_size, hidden_size)
    w3 = lin_w(k3, hidden_size, num_classes)
    b_bound = 1.0 / jnp.sqrt(hidden_size)
    b3 = jax.random.uniform(k4, (1, num_classes), dtype, -b_bound, b_bound)
    return w1, w2, w3, b3


if __name__ == "__main__":
    # Small shapes consistent with the module's forward: x is (batch, in_channels).
    batch = 8
    in_channels = 32
    hidden_size = 64
    num_classes = 16

    key = jax.random.PRNGKey(0)
    kx, kp = jax.random.split(key)
    x = jax.random.normal(kx, (batch, in_channels), jnp.float32)
    w1, w2, w3, b3 = init_params(kp, in_channels, hidden_size, num_classes)

    out = linear_classifier_forward(x, w1, w2, w3, b3)
    out = jax.block_until_ready(out)
    assert out.shape == (batch, num_classes)

    # Reference mirroring the kernel's numerics (bf16 MXU inputs, f32 accumulation,
    # eval-mode dropout = identity).
    xb = x.astype(jnp.bfloat16)
    w1b, w2b, w3b = (w.astype(jnp.bfloat16) for w in (w1, w2, w3))
    h = jnp.dot(xb, w1b, preferred_element_type=jnp.float32)
    h = jnp.maximum(h, 0.0).astype(jnp.bfloat16)
    h = jnp.dot(h, w2b, preferred_element_type=jnp.float32)
    h = jnp.maximum(h, 0.0).astype(jnp.bfloat16)
    ref = (jnp.dot(h, w3b, preferred_element_type=jnp.float32) + b3).astype(x.dtype)
    assert jnp.allclose(out, ref, atol=1e-4, rtol=1e-4)

    # Sanity check vs. pure-f32 math (bf16 rounding tolerance).
    ref_f32 = jnp.maximum(x @ w1, 0.0)
    ref_f32 = jnp.maximum(ref_f32 @ w2, 0.0)
    ref_f32 = ref_f32 @ w3 + b3
    assert jnp.allclose(out, ref_f32, atol=5e-2, rtol=5e-2)

    print("KERNEL_OK")
</pallas_src>

<mosaic_0001>
module attributes {stable_mosaic.version = 11 : i64} {
  func.func @_mlp_kernel(%arg0: i32, %arg1: memref<8x128xbf16, #tpu.memory_space<vmem>>, %arg2: memref<128x128xbf16, #tpu.memory_space<vmem>>, %arg3: memref<128x128xbf16, #tpu.memory_space<vmem>>, %arg4: memref<128x128xbf16, #tpu.memory_space<vmem>>, %arg5: memref<1x128xf32, #tpu.memory_space<vmem>>, %arg6: memref<8x128xf32, #tpu.memory_space<vmem>>) attributes {dimension_semantics = [#tpu.dimension_semantics<parallel>], iteration_bounds = array<i64: 1>, scalar_prefetch = 0 : i64, scratch_operands = 0 : i64, tpu.core_type = #tpu.core_type<tc>, window_params = [{transform_indices = @transform_0, window_bounds = array<i64: 8, 128>}, {pipeline_mode = #tpu.pipeline_mode<synchronous>, transform_indices = @transform_1, window_bounds = array<i64: 128, 128>}, {pipeline_mode = #tpu.pipeline_mode<synchronous>, transform_indices = @transform_2, window_bounds = array<i64: 128, 128>}, {pipeline_mode = #tpu.pipeline_mode<synchronous>, transform_indices = @transform_3, window_bounds = array<i64: 128, 128>}, {pipeline_mode = #tpu.pipeline_mode<synchronous>, transform_indices = @transform_4, window_bounds = array<i64: 1, 128>}, {transform_indices = @transform_5, window_bounds = array<i64: 8, 128>}]} {
    %c0 = arith.constant 0 : index
    %c0_0 = arith.constant 0 : index
    %0 = vector.load %arg1[%c0, %c0_0] : memref<8x128xbf16, #tpu.memory_space<vmem>>, vector<8x128xbf16>
    %c0_1 = arith.constant 0 : index
    %c0_2 = arith.constant 0 : index
    %1 = vector.load %arg2[%c0_1, %c0_2] : memref<128x128xbf16, #tpu.memory_space<vmem>>, vector<128x128xbf16>
    %cst = arith.constant dense<0.000000e+00> : vector<8x128xf32>
    %2 = tpu.matmul %0, %1, %cst {dimension_numbers = #tpu.dot_dimension_numbers<[1], [0], [0], [1], [0, 0, 1, 1], [], []>} : vector<8x128xbf16>, vector<128x128xbf16>, vector<8x128xf32> -> vector<8x128xf32>
    %cst_3 = arith.constant 0.000000e+00 : f32
    %3 = vector.broadcast %cst_3 : f32 to vector<8x128xf32>
    %4 = arith.maximumf %2, %3 : vector<8x128xf32>
    %5 = arith.truncf %4 : vector<8x128xf32> to vector<8x128xbf16>
    %c0_4 = arith.constant 0 : index
    %c0_5 = arith.constant 0 : index
    %6 = vector.load %arg3[%c0_4, %c0_5] : memref<128x128xbf16, #tpu.memory_space<vmem>>, vector<128x128xbf16>
    %cst_6 = arith.constant dense<0.000000e+00> : vector<8x128xf32>
    %7 = tpu.matmul %5, %6, %cst_6 {dimension_numbers = #tpu.dot_dimension_numbers<[1], [0], [0], [1], [0, 0, 1, 1], [], []>} : vector<8x128xbf16>, vector<128x128xbf16>, vector<8x128xf32> -> vector<8x128xf32>
    %cst_7 = arith.constant 0.000000e+00 : f32
    %8 = vector.broadcast %cst_7 : f32 to vector<8x128xf32>
    %9 = arith.maximumf %7, %8 : vector<8x128xf32>
    %10 = arith.truncf %9 : vector<8x128xf32> to vector<8x128xbf16>
    %c0_8 = arith.constant 0 : index
    %c0_9 = arith.constant 0 : index
    %11 = vector.load %arg4[%c0_8, %c0_9] : memref<128x128xbf16, #tpu.memory_space<vmem>>, vector<128x128xbf16>
    %cst_10 = arith.constant dense<0.000000e+00> : vector<8x128xf32>
    %12 = tpu.matmul %10, %11, %cst_10 {dimension_numbers = #tpu.dot_dimension_numbers<[1], [0], [0], [1], [0, 0, 1, 1], [], []>} : vector<8x128xbf16>, vector<128x128xbf16>, vector<8x128xf32> -> vector<8x128xf32>
    %c0_11 = arith.constant 0 : index
    %c0_12 = arith.constant 0 : index
    %13 = vector.load %arg5[%c0_11, %c0_12] : memref<1x128xf32, #tpu.memory_space<vmem>>, vector<1x128xf32>
    %14 = vector.broadcast %13 : vector<1x128xf32> to vector<8x128xf32>
    %15 = arith.addf %12, %14 : vector<8x128xf32>
    %c0_13 = arith.constant 0 : index
    %c0_14 = arith.constant 0 : index
    %16 = vector.load %arg6[%c0_13, %c0_14] : memref<8x128xf32, #tpu.memory_space<vmem>>, vector<8x128xf32>
    tpu.vector_store %arg6[%c0_13, %c0_14], %15 {strides = array<i32>} : memref<8x128xf32, #tpu.memory_space<vmem>>, vector<8x128xf32>,
    return
  }
  func.func @transform_0(%arg0: i32) -> (i32, i32) {
    %c0_i32 = arith.constant 0 : i32
    %c0_i32_0 = arith.constant 0 : i32
    return %arg0, %c0_i32 : i32, i32
  }
  func.func @transform_1(%arg0: i32) -> (i32, i32) {
    %c0_i32 = arith.constant 0 : i32
    %c0_i32_0 = arith.constant 0 : i32
    %c0_i32_1 = arith.constant 0 : i32
    return %c0_i32, %c0_i32_0 : i32, i32
  }
  func.func @transform_2(%arg0: i32) -> (i32, i32) {
    %c0_i32 = arith.constant 0 : i32
    %c0_i32_0 = arith.constant 0 : i32
    %c0_i32_1 = arith.constant 0 : i32
    return %c0_i32, %c0_i32_0 : i32, i32
  }
  func.func @transform_3(%arg0: i32) -> (i32, i32) {
    %c0_i32 = arith.constant 0 : i32
    %c0_i32_0 = arith.constant 0 : i32
    %c0_i32_1 = arith.constant 0 : i32
    return %c0_i32, %c0_i32_0 : i32, i32
  }
  func.func @transform_4(%arg0: i32) -> (i32, i32) {
    %c0_i32 = arith.constant 0 : i32
    %c0_i32_0 = arith.constant 0 : i32
    %c0_i32_1 = arith.constant 0 : i32
    return %c0_i32, %c0_i32_0 : i32, i32
  }
  func.func @transform_5(%arg0: i32) -> (i32, i32) {
    %c0_i32 = arith.constant 0 : i32
    %c0_i32_0 = arith.constant 0 : i32
    return %arg0, %c0_i32 : i32, i32
  }
}

</mosaic_0001>

<bundles_post_ra>
// kernel: tpu_custom_call.1
= control target key start
LH: loop header
LB: loop body
LE: loop exit
PB: predicated region body
PF: predicated region fallthrough
CT: control target
= control target key end

     0   :  { %10 = vsyncpa [#allocation3], 0  ;;  %s821_s0 = inlined_call_operand.hbm [shape: bf16[8,128], index: 0, kind: input, shape index: {}]   ;;  %s822_s1 = inlined_call_operand.hbm [shape: bf16[128,128], index: 1, kind: input, shape index: {}]   ;;  %s823_s2 = inlined_call_operand.hbm [shape: bf16[128,128], index: 2, kind: input, shape index: {}]   ;;  %s824_s3 = inlined_call_operand.hbm [shape: bf16[128,128], index: 3, kind: input, shape index: {}]   ;;  %s825_s4 = inlined_call_operand.vmem [shape: f32[1,128], index: 4, kind: input, shape index: {}]   ;;  %s826_s5 = inlined_call_operand.hbm [shape: f32[8,128], index: 5, kind: output, shape index: {}]  }
   0x1   :  { %11 = vsyncpa [#allocation6], 0 }
   0x2   :  { %12 = vsyncpa [#allocation9], 0 }
   0x3   :  { %13 = vsyncpa [#allocation4], 0  ;;  %s680_s18 = smov [#allocation5]   ;;  %s562_s22 = scalar_lea.hbm %s822_s1, 1024 }
   0x4   :  { %s29_s19 = sshll.u32 %s680_s18, 4  ;;  %p563_p0 = scmp.ne.s32.totalorder %s822_s1, %s562_s22  ;;  %s30_s19 = int_to_ptr.vmem [resolvable:$true] %s29_s19 }
   0x5   :  { %p566_p1 = scmp.lt.u32.totalorder %s562_s22, %s822_s1 }
   0x7   :  { %p568_p2 = pnand %p566_p1, %p563_p0 }
   0x9   :  { %571 = shalt.err (!%p568_p2)
}
   0xa   :  { %s572_s27 = scalar_lea.vmem %s30_s19, 1024  ;;  %p577_p4 = scmp.lt.s32.totalorder %s30_s19, %s30_s19 }
   0xb   :  { %p573_p3 = scmp.ne.s32.totalorder %s30_s19, %s572_s27  ;;  %p578_p5 = scmp.lt.s32.totalorder %s572_s27, %s572_s27 }
   0xd   :  { %p579_p6 = por %p578_p5, %p577_p4 }
   0xf   :  { %p580_p7 = pnand %p579_p6, %p573_p3 }
  0x11   :  { %583 = shalt.err (!%p580_p7)
}
  0x12   :  { %s681_s28 = smov 64   ;;  %s682_s29 = smov 4  }
  0x13   :  { %35 = dma.hbm_to_vmem [thread:$0]  %s822_s1, 1024, %s30_s19, [#allocation6], %s681_s28, %s681_s28, %s682_s29  }
  0x14   :  { %s683_s7 = smov [#allocation2]   ;;  %s684_s9 = smov [#allocation7]  }
  0x15   :  { %s20_s8 = sshll.u32 %s683_s7, 4  ;;  %s41_s10 = sshll.u32 %s684_s9, 4  ;;  %s21_s8 = int_to_ptr.vmem [resolvable:$true] %s20_s8  ;;  %s42_s10 = int_to_ptr.vmem [resolvable:$true] %s41_s10 }
  0x16   :  { %s584_s13 = scalar_lea.hbm %s821_s0, 64 }
  0x17   :  { %p585_p8 = scmp.ne.s32.totalorder %s821_s0, %s584_s13  ;;  %p588_p9 = scmp.lt.u32.totalorder %s584_s13, %s821_s0 }
  0x19   :  { %p590_p10 = pnand %p588_p9, %p585_p8 }
  0x1b   :  { %593 = shalt.err (!%p590_p10)
}
  0x1c   :  { %s594_s1 = scalar_lea.vmem %s21_s8, 64  ;;  %p599_p12 = scmp.lt.s32.totalorder %s21_s8, %s21_s8 }
  0x1d   :  { %p595_p11 = scmp.ne.s32.totalorder %s21_s8, %s594_s1  ;;  %p600_p13 = scmp.lt.s32.totalorder %s594_s1, %s594_s1 }
  0x1f   :  { %p601_p0 = por %p600_p13, %p599_p12 }
  0x21   :  { %p602_p1 = pnand %p601_p0, %p595_p11 }
  0x23   :  { %605 = shalt.err (!%p602_p1)
}
  0x24   :  { %23 = dma.hbm_to_vmem [thread:$0]  %s821_s0, 64, %s21_s8, [#allocation3]  }
  0x25   :  { %s606_s22 = scalar_lea.hbm %s823_s2, 1024 }
  0x26   :  { %p607_p2 = scmp.ne.s32.totalorder %s823_s2, %s606_s22  ;;  %p610_p3 = scmp.lt.u32.totalorder %s606_s22, %s823_s2 }
  0x28   :  { %p612_p4 = pnand %p610_p3, %p607_p2 }
  0x2a   :  { %615 = shalt.err (!%p612_p4)
}
  0x2b   :  { %s616_s27 = scalar_lea.vmem %s42_s10, 1024  ;;  %p621_p6 = scmp.lt.s32.totalorder %s42_s10, %s42_s10 }
  0x2c   :  { %p617_p5 = scmp.ne.s32.totalorder %s42_s10, %s616_s27  ;;  %p622_p7 = scmp.lt.s32.totalorder %s616_s27, %s616_s27 }
  0x2e   :  { %p623_p8 = por %p622_p7, %p621_p6 }
  0x30   :  { %p624_p9 = pnand %p623_p8, %p617_p5 }
  0x32   :  { %627 = shalt.err (!%p624_p9)
}
  0x33   :  { %47 = dma.hbm_to_vmem [thread:$0]  %s823_s2, 1024, %s42_s10, [#allocation6], %s681_s28, %s681_s28, %s682_s29  }
  0x34   :  { %s685_s6 = smov [#allocation8]   ;;  %s628_s11 = scalar_lea.hbm %s824_s3, 1024 }
  0x35   :  { %s53_s7 = sshll.u32 %s685_s6, 4  ;;  %p629_p10 = scmp.ne.s32.totalorder %s824_s3, %s628_s11  ;;  %s54_s7 = int_to_ptr.vmem [resolvable:$true] %s53_s7 }
  0x36   :  { %p632_p11 = scmp.lt.u32.totalorder %s628_s11, %s824_s3 }
  0x38   :  { %p634_p12 = pnand %p632_p11, %p629_p10 }
  0x3a   :  { %637 = shalt.err (!%p634_p12)
}
  0x3b   :  { %s638_s16 = scalar_lea.vmem %s54_s7, 1024  ;;  %p643_p0 = scmp.lt.s32.totalorder %s54_s7, %s54_s7 }
  0x3c   :  { %p639_p13 = scmp.ne.s32.totalorder %s54_s7, %s638_s16  ;;  %p644_p1 = scmp.lt.s32.totalorder %s638_s16, %s638_s16 }
  0x3e   :  { %p645_p2 = por %p644_p1, %p643_p0 }
  0x40   :  { %p646_p3 = pnand %p645_p2, %p639_p13 }
  0x42   :  { %649 = shalt.err (!%p646_p3)
}
  0x43   :  { %59 = dma.hbm_to_vmem [thread:$0]  %s824_s3, 1024, %s54_s7, [#allocation9], %s681_s28, %s681_s28, %s682_s29  }
  0x44   :  { %672 = dma.done.wait [#allocation3], 64  }
  0x45   :  { %673 = vsyncadd [#allocation3], 4294967232 }
  0x46   :  { %674 = dma.done.wait [#allocation6], 2048  }
  0x47   :  { %675 = vsyncadd [#allocation6], 4294965248 }
  0x48   :  { %676 = dma.done.wait [#allocation9], 1024  }
  0x49   :  { %677 = vsyncadd [#allocation9], 4294966272  ;;  %v686_v0 = vmov 0.0   ;;  %vm687_vm0 = vmmov 0   ;;  %v538_v1 = vld [vmem:[#allocation5] sm:$0xff]   ;;  %v539_v2 = vld [vmem:[#allocation5 + $0x8] sm:$0xff]  }
  0x4a   :  { %469 = vmatprep.subr.bf16.mxu0 %v686_v0  ;;  %485 = vmatprep.mubr.msk.bf16.mxu0 %vm687_vm0, %v686_v0  ;;  %v540_v3 = vld [vmem:[#allocation5 + $0x10] sm:$0xff]   ;;  %v546_v4 = vld [vmem:[#allocation7] sm:$0xff]   ;;  %v541_v5 = vld [vmem:[#allocation5 + $0x18] sm:$0xff]   ;;  %s688_s29 = smov [#allocation10]  }
  0x4b   :  { %489 = vmatprep.subr.bf16.mxu1 %v686_v0  ;;  %505 = vmatprep.mubr.msk.bf16.mxu1 %vm687_vm0, %v686_v0  ;;  %v547_v6 = vld [vmem:[#allocation7 + $0x8] sm:$0xff]   ;;  %v542_v7 = vld [vmem:[#allocation5 + $0x20] sm:$0xff]   ;;  %v548_v8 = vld [vmem:[#allocation7 + $0x10] sm:$0xff]   ;;  %s406_s17 = sshll.u32 %s688_s29, 4  ;;  %s407_s17 = int_to_ptr.vmem [resolvable:$true] %s406_s17 }
  0x4c   :  { %470 = vmatpush3.bf16.msra.mxu0 %v538_v1  ;;  %490 = vmatpush3.bf16.msra.mxu1 %v546_v4  ;;  %v543_v9 = vld [vmem:[#allocation5 + $0x28] sm:$0xff]   ;;  %v549_v10 = vld [vmem:[#allocation7 + $0x18] sm:$0xff]   ;;  %v544_v11 = vld [vmem:[#allocation5 + $0x30] sm:$0xff]   ;;  %s650_s1 = scalar_lea.vmem %s407_s17, 128  ;;  %p655_p5 = scmp.lt.s32.totalorder %s407_s17, %s407_s17 }
  0x4d   :  { %471 = vmatprep.subr.bf16.mxu0 %v686_v0  ;;  %491 = vmatprep.subr.bf16.mxu1 %v686_v0  ;;  %v550_v12 = vld [vmem:[#allocation7 + $0x20] sm:$0xff]   ;;  %v545_v13 = vld [vmem:[#allocation5 + $0x38] sm:$0xff]   ;;  %v551_v14 = vld [vmem:[#allocation7 + $0x28] sm:$0xff]   ;;  %p651_p4 = scmp.ne.s32.totalorder %s407_s17, %s650_s1  ;;  %p656_p6 = scmp.lt.s32.totalorder %s650_s1, %s650_s1 }
  0x4e   :  { %v75_v15 = vld [vmem:[#allocation2] sm:$0xf]  ;;  %v552_v16 = vld [vmem:[#allocation7 + $0x30] sm:$0xff]   ;;  %v554_v18 = vld [vmem:[#allocation8] sm:$0xff]  }
  0x4f   :  { %v553_v17 = vld [vmem:[#allocation7 + $0x38] sm:$0xff]   ;;  %v555_v19 = vld [vmem:[#allocation8 + $0x8] sm:$0xff]   ;;  %v556_v20 = vld [vmem:[#allocation8 + $0x10] sm:$0xff]   ;;  %p657_p7 = por %p656_p6, %p655_p5 }
  0x50   :  { %472 = vmatpush3.bf16.msra.mxu0 %v539_v2  ;;  %492 = vmatpush3.bf16.msra.mxu1 %v547_v6  ;;  %v557_v21 = vld [vmem:[#allocation8 + $0x18] sm:$0xff]   ;;  %v558_v22 = vld [vmem:[#allocation8 + $0x20] sm:$0xff]   ;;  %v559_v23 = vld [vmem:[#allocation8 + $0x28] sm:$0xff]  }
  0x51   :  { %473 = vmatprep.subr.bf16.mxu0 %v686_v0  ;;  %493 = vmatprep.subr.bf16.mxu1 %v686_v0  ;;  %v560_v24 = vld [vmem:[#allocation8 + $0x30] sm:$0xff]   ;;  %v561_v31 = vld [vmem:[#allocation8 + $0x38] sm:$0xff]   ;;  %p658_p8 = pnand %p657_p7, %p651_p4 }
  0x52   :  { %v433_v38 = vld [vmem:[%s825_s4] ss:$0 sm:$0xff] }
  0x54   :  { %474 = vmatpush3.bf16.msra.mxu0 %v540_v3  ;;  %494 = vmatpush3.bf16.msra.mxu1 %v548_v8 }
  0x55   :  { %475 = vmatprep.subr.bf16.mxu0 %v686_v0  ;;  %495 = vmatprep.subr.bf16.mxu1 %v686_v0 }
  0x58   :  { %476 = vmatpush3.bf16.msra.mxu0 %v541_v5  ;;  %496 = vmatpush3.bf16.msra.mxu1 %v549_v10 }
  0x59   :  { %477 = vmatprep.subr.bf16.mxu0 %v686_v0  ;;  %497 = vmatprep.subr.bf16.mxu1 %v686_v0 }
  0x5c   :  { %478 = vmatpush3.bf16.msra.mxu0 %v542_v7  ;;  %498 = vmatpush3.bf16.msra.mxu1 %v550_v12 }
  0x5d   :  { %479 = vmatprep.subr.bf16.mxu0 %v686_v0  ;;  %499 = vmatprep.subr.bf16.mxu1 %v686_v0 }
  0x60   :  { %480 = vmatpush3.bf16.msra.mxu0 %v543_v9  ;;  %500 = vmatpush3.bf16.msra.mxu1 %v551_v14 }
  0x61   :  { %481 = vmatprep.subr.bf16.mxu0 %v686_v0  ;;  %501 = vmatprep.subr.bf16.mxu1 %v686_v0 }
  0x64   :  { %482 = vmatpush3.bf16.msra.mxu0 %v544_v11  ;;  %502 = vmatpush3.bf16.msra.mxu1 %v552_v16 }
  0x65   :  { %483 = vmatprep.subr.bf16.mxu0 %v686_v0  ;;  %503 = vmatprep.subr.bf16.mxu1 %v686_v0 }
  0x68   :  { %484 = vmatpush3.bf16.msra.mxu0 %v545_v13  ;;  %504 = vmatpush3.bf16.msra.mxu1 %v553_v17 }
  0x69   :  { %509 = vmatprep.subr.bf16.mxu0 %v686_v0 }
  0x6b   :  { %486 = vmatmul.mubr.bf16.vlgmr.msra.gmra.mrb[0].mxu0 %v75_v15 }
  0x6c   :  { %525 = vmatprep.mubr.msk.bf16.mxu0 %vm687_vm0, %v686_v0  ;;  %510 = vmatpush3.bf16.msra.mxu0 %v554_v18 }
  0x6d   :  { %511 = vmatprep.subr.bf16.mxu0 %v686_v0 }
  0x70   :  { %512 = vmatpush3.bf16.msra.mxu0 %v555_v19 }
  0x71   :  { %513 = vmatprep.subr.bf16.mxu0 %v686_v0 }
  0x74   :  { %514 = vmatpush3.bf16.msra.mxu0 %v556_v20 }
  0x75   :  { %515 = vmatprep.subr.bf16.mxu0 %v686_v0 }
  0x78   :  { %516 = vmatpush3.bf16.msra.mxu0 %v557_v21 }
  0x79   :  { %517 = vmatprep.subr.bf16.mxu0 %v686_v0 }
  0x7c   :  { %518 = vmatpush3.bf16.msra.mxu0 %v558_v22 }
  0x7d   :  { %519 = vmatprep.subr.bf16.mxu0 %v686_v0 }
  0x80   :  { %520 = vmatpush3.bf16.msra.mxu0 %v559_v23 }
  0x81   :  { %521 = vmatprep.subr.bf16.mxu0 %v686_v0 }
  0x84   :  { %522 = vmatpush3.bf16.msra.mxu0 %v560_v24 }
  0x85   :  { %523 = vmatprep.subr.bf16.mxu0 %v686_v0 }
  0x88   :  { %524 = vmatpush3.bf16.msra.mxu0 %v561_v31 }
 0x13e   :  { %v174_v25 = vpop.f32.mrb[0].mxu0 }
 0x13f   :  { %v180_v26 = vmax.f32 %v174_v25, 0.0  ;;  %v487_v27 = vpop.f32.mrb[1].mxu0 }
 0x140   :  { %v177_v28 = vpop.f32.mrb[2].mxu0 }
 0x141   :  { %v181_v29 = vpack.c.bf16 %v180_v26, %v180_v26  ;;  %v488_v30 = vpop.f32.mrb[3].mxu0 }
 0x143   :  { %506 = vmatmul.mubr.bf16.vlgmr.msra.gmra.mrb[0].mxu1 %v181_v29 }
 0x216   :  { %v280_v32 = vpop.f32.mrb[0].mxu1 }
 0x217   :  { %v286_v33 = vmax.f32 %v280_v32, 0.0  ;;  %v507_v34 = vpop.f32.mrb[1].mxu1 }
 0x218   :  { %v283_v35 = vpop.f32.mrb[2].mxu1 }
 0x219   :  { %v287_v36 = vpack.c.bf16 %v286_v33, %v286_v33  ;;  %v508_v37 = vpop.f32.mrb[3].mxu1 }
 0x21b   :  { %526 = vmatmul.mubr.bf16.vlgmr.msra.gmra.mrb[4].mxu0 %v287_v36 }
 0x2ee   :  { %v393_v39 = vpop.f32.mrb[4].mxu0 }
 0x2ef   :  { %v394_v40 = vadd.f32 %v433_v38, %v393_v39  ;;  %v527_v41 = vpop.f32.mrb[5].mxu0 }
 0x2f0   :  { %v396_v42 = vpop.f32.mrb[6].mxu0 }
 0x2f1   :  { %399 = vst [vmem:[#allocation10] sm:$0xff] %v394_v40  ;;  %v528_v43 = vpop.f32.mrb[7].mxu0 }
 0x2f2   :  { %661 = shalt.err (!%p658_p8)
}
 0x2f3   :  { %s662_s4 = scalar_lea.hbm %s826_s5, 128 }
 0x2f4   :  { %p663_p9 = scmp.ne.s32.totalorder %s826_s5, %s662_s4  ;;  %p666_p10 = scmp.lt.u32.totalorder %s662_s4, %s826_s5 }
 0x2f6   :  { %p668_p11 = pnand %p666_p10, %p663_p9 }
 0x2f8   :  { %671 = shalt.err (!%p668_p11)
}
 0x2f9   :  { %409 = dma.vmem_to_hbm [thread:$0]  %s407_s17, 128, %s826_s5, [#allocation4]  }
 0x2fa   :  { %678 = dma.done.wait [#allocation4], 128  }
 0x2fb   :  { %679 = vsyncadd [#allocation4], 4294967168 }
 0x2fc   :  { %413 = vsyncpa [#allocation3], 1 }
 0x2fd   :  { %414 = vsyncpa [#allocation6], 1 }
 0x2fe   :  { %415 = vsyncpa [#allocation9], 1 }
 0x2ff   :  { %416 = vsyncpa [#allocation4], 1 }

</bundles_post_ra>
